<compile_context>
chip_gen: v6e
topology: v6e:2x2x1
jax: 0.10.0
libtpu: 0.0.40
codegen_flags: <defaults>
</compile_context>

<pallas_src>
import functools

import jax
import jax.numpy as jnp
from jax.experimental import pallas as pl
from jax.experimental.pallas import tpu as pltpu


def _round_up(x, m):
    return (x + m - 1) // m * m


def _round_down(x, m):
    return x // m * m


def _vmem_budget_bytes():
    """Budget for all live (double-buffered) pipeline buffers, per chip gen."""
    try:
        kind = jax.devices()[0].device_kind.lower()
    except Exception:
        kind = ""
    if "v5" in kind:
        # v5e: ~0.82 TB/s HBM -> 2 MiB-ish blocks already hide per-step
        # overhead; keep the live set small (scoped default is 16 MiB).
        return 12 << 20
    # v6e / v7x: higher HBM BW, bigger blocks needed to amortize step overhead.
    return 32 << 20


# ---------------------------------------------------------------------------
# Path A: full row in one block (common case) -> output written directly as
# (B, 3n), three static column-slice stores per step.
# ---------------------------------------------------------------------------
def _relu_cat3_rowblock_kernel(x_ref, o_ref, *, n):
    r = jnp.maximum(x_ref[...], 0)
    o_ref[:, 0:n] = r
    o_ref[:, n:2 * n] = r
    o_ref[:, 2 * n:3 * n] = r


def _relu_cat3_rowblocks(x_flat):
    B, n = x_flat.shape
    itemsize = jnp.dtype(x_flat.dtype).itemsize
    budget = _vmem_budget_bytes()

    # live bytes per row: (1 input + 3 output) * 2 pipeline buffers
    row_bytes = 8 * n * itemsize
    tb_cap = max(8, _round_down(budget // row_bytes, 8))

    if B <= tb_cap:
        tb = B                       # full dim -> exempt from the 8-rule
        if B >= 16:                  # split so v7x's 2 TCs both get a tile
            tb = _round_up((B + 1) // 2, 8)
    else:
        tb = tb_cap                  # multiple of 8; edge block is partial

    grid = (pl.cdiv(B, tb),)
    kernel = functools.partial(_relu_cat3_rowblock_kernel, n=n)
    return pl.pallas_call(
        kernel,
        out_shape=jax.ShapeDtypeStruct((B, 3 * n), x_flat.dtype),
        grid=grid,
        in_specs=[pl.BlockSpec((tb, n), lambda i: (i, 0))],
        out_specs=pl.BlockSpec((tb, 3 * n), lambda i: (i, 0)),
        compiler_params=pltpu.CompilerParams(
            dimension_semantics=("parallel",),
            vmem_limit_bytes=budget + (16 << 20),
        ),
    )(x_flat)


# ---------------------------------------------------------------------------
# Path B: n too large for a single row block -> tile the n axis.  Output is
# (B, 3, n) with all 3 copies in one block; reshaped to (B, 3n) by the caller
# (contiguous-dim collapse, no HBM round trip).
# ---------------------------------------------------------------------------
def _relu_cat3_colblock_kernel(x_ref, o_ref):
    r = jnp.maximum(x_ref[...], 0)
    o_ref[:, 0, :] = r
    o_ref[:, 1, :] = r
    o_ref[:, 2, :] = r


def _relu_cat3_colblocks(x_flat, *, tb=None, tn=None):
    B, n = x_flat.shape
    itemsize = jnp.dtype(x_flat.dtype).itemsize
    budget = _vmem_budget_bytes()

    if tb is None:
        tb = B if B <= 8 else min(256, _round_down(B, 8))
    if tn is None:
        # live bytes per step: (1 in + 3 out) * 2 buffers = 8 * tb * tn * item
        tn_cap = max(128, _round_down(budget // (8 * tb * itemsize), 128))
        tn = min(tn_cap, _round_up(n, 128))

    grid = (pl.cdiv(B, tb), pl.cdiv(n, tn))
    out3 = pl.pallas_call(
        _relu_cat3_colblock_kernel,
        out_shape=jax.ShapeDtypeStruct((B, 3, n), x_flat.dtype),
        grid=grid,
        in_specs=[pl.BlockSpec((tb, tn), lambda i, j: (i, j))],
        out_specs=pl.BlockSpec((tb, 3, tn), lambda i, j: (i, 0, j)),
        compiler_params=pltpu.CompilerParams(
            dimension_semantics=("parallel", "parallel"),
            vmem_limit_bytes=budget + (16 << 20),
        ),
    )(x_flat)
    return out3.reshape(B, 3 * n)


def _cat3_relu_pallas(x_flat):
    B, n = x_flat.shape
    itemsize = jnp.dtype(x_flat.dtype).itemsize
    budget = _vmem_budget_bytes()
    # Row-block path whenever even the smallest legal row block fits the
    # live-buffer budget; otherwise tile the n axis.
    if min(8, B) * 8 * n * itemsize <= budget:
        return _relu_cat3_rowblocks(x_flat)
    return _relu_cat3_colblocks(x_flat)


def model_forward(x, *, force_pallas=False):
    """x: (B, C, ...) float array -> (B, 3*prod(rest)) = relu(cat((x,x,x),1)).view(B,-1)."""
    B = x.shape[0]
    n = 1
    for d in x.shape[1:]:
        n *= d
    x_flat = x.reshape(B, n)  # contiguous-dim collapse (free under XLA)

    itemsize = jnp.dtype(x.dtype).itemsize
    # Kernel HBM traffic = 1 read + 3 writes of x; below ~1 MiB of traffic the
    # pallas_call launch / pipeline ramp dominates -> let XLA fuse it.
    if not force_pallas and 4 * B * n * itemsize < (1 << 20):
        return jnp.tile(jnp.maximum(x_flat, 0), (1, 3))

    return _cat3_relu_pallas(x_flat)


def _reference(x):
    y = jnp.concatenate((x, x, x), axis=1).reshape(x.shape[0], -1)
    t1 = jnp.maximum(y, 0)
    # the (1,3) shape-check branch of the torch module returns the same value
    return t1.reshape(y.shape[0], -1)


if __name__ == "__main__":
    key = jax.random.PRNGKey(0)

    # Shape from the original module: x = torch.randn(2, 3, 4)
    x = jax.random.normal(key, (2, 3, 4), dtype=jnp.float32)
    out = jax.block_until_ready(model_forward(x, force_pallas=True))
    ref = _reference(x)
    assert out.shape == ref.shape == (2, 36), out.shape
    assert bool(jnp.array_equal(out, ref)), "mismatch vs reference (small path)"

    # Larger, tile-friendly shape: exercises the row-block path + megacore split.
    x2 = jax.random.normal(jax.random.PRNGKey(1), (64, 16, 32), dtype=jnp.float32)
    out2 = jax.block_until_ready(model_forward(x2, force_pallas=True))
    ref2 = _reference(x2)
    assert out2.shape == ref2.shape == (64, 3 * 16 * 32), out2.shape
    assert bool(jnp.array_equal(out2, ref2)), "mismatch vs reference (row-block path)"

    # Ragged shape forced through the column-tiled path (partial edge blocks,
    # no wrapper padding anywhere).
    x3 = jax.random.normal(jax.random.PRNGKey(2), (5, 2, 150), dtype=jnp.float32)
    out3 = jax.block_until_ready(_relu_cat3_colblocks(x3.reshape(5, -1), tn=128))
    ref3 = _reference(x3)
    assert out3.shape == ref3.shape == (5, 3 * 2 * 150), out3.shape
    assert bool(jnp.array_equal(out3, ref3)), "mismatch vs reference (col-tiled path)"

    print("KERNEL_OK")
</pallas_src>

<mosaic_0001>
module attributes {stable_mosaic.version = 11 : i64} {
  func.func @_relu_cat3_rowblock_kernel(%arg0: i32, %arg1: memref<2x12xf32, #tpu.memory_space<vmem>>, %arg2: memref<2x36xf32, #tpu.memory_space<vmem>>) attributes {dimension_semantics = [#tpu.dimension_semantics<parallel>], iteration_bounds = array<i64: 1>, scalar_prefetch = 0 : i64, scratch_operands = 0 : i64, tpu.core_type = #tpu.core_type<tc>, window_params = [{transform_indices = @transform_0, window_bounds = array<i64: 2, 12>}, {transform_indices = @transform_1, window_bounds = array<i64: 2, 36>}]} {
    %c0 = arith.constant 0 : index
    %c0_0 = arith.constant 0 : index
    %0 = vector.load %arg1[%c0, %c0_0] : memref<2x12xf32, #tpu.memory_space<vmem>>, vector<2x12xf32>
    %cst = arith.constant 0.000000e+00 : f32
    %1 = vector.broadcast %cst : f32 to vector<2x12xf32>
    %2 = arith.maximumf %0, %1 : vector<2x12xf32>
    %c0_1 = arith.constant 0 : index
    %c0_2 = arith.constant 0 : index
    %3 = vector.load %arg2[%c0_1, %c0_2] : memref<2x36xf32, #tpu.memory_space<vmem>>, vector<2x12xf32>
    tpu.vector_store %arg2[%c0_1, %c0_2], %2 {strides = array<i32>} : memref<2x36xf32, #tpu.memory_space<vmem>>, vector<2x12xf32>,
    %c0_3 = arith.constant 0 : index
    %c12 = arith.constant 12 : index
    %4 = vector.load %arg2[%c0_3, %c12] : memref<2x36xf32, #tpu.memory_space<vmem>>, vector<2x12xf32>
    tpu.vector_store %arg2[%c0_3, %c12], %2 {strides = array<i32>} : memref<2x36xf32, #tpu.memory_space<vmem>>, vector<2x12xf32>,
    %c0_4 = arith.constant 0 : index
    %c24 = arith.constant 24 : index
    %5 = vector.load %arg2[%c0_4, %c24] : memref<2x36xf32, #tpu.memory_space<vmem>>, vector<2x12xf32>
    tpu.vector_store %arg2[%c0_4, %c24], %2 {strides = array<i32>} : memref<2x36xf32, #tpu.memory_space<vmem>>, vector<2x12xf32>,
    return
  }
  func.func @transform_0(%arg0: i32) -> (i32, i32) {
    %c0_i32 = arith.constant 0 : i32
    %c0_i32_0 = arith.constant 0 : i32
    return %arg0, %c0_i32 : i32, i32
  }
  func.func @transform_1(%arg0: i32) -> (i32, i32) {
    %c0_i32 = arith.constant 0 : i32
    %c0_i32_0 = arith.constant 0 : i32
    return %arg0, %c0_i32 : i32, i32
  }
}

</mosaic_0001>

<bundles_post_ra>
// kernel: tpu_custom_call.1
= control target key start
LH: loop header
LB: loop body
LE: loop exit
PB: predicated region body
PF: predicated region fallthrough
CT: control target
= control target key end

     0   :  { %6 = vsyncpa [#allocation3], 0  ;;  %s119_s0 = inlined_call_operand.hbm [shape: f32[2,12], index: 0, kind: input, shape index: {}]   ;;  %s120_s1 = inlined_call_operand.hbm [shape: f32[2,36], index: 1, kind: output, shape index: {}]  }
   0x1   :  { %7 = vsyncpa [#allocation4], 0  ;;  %s99_s6 = smov [#allocation2]  }
   0x2   :  { %s14_s7 = sshll.u32 %s99_s6, 4  ;;  %s15_s7 = int_to_ptr.vmem [resolvable:$true] %s14_s7 }
   0x3   :  { %s63_s8 = scalar_lea.vmem %s15_s7, 32  ;;  %p68_p1 = scmp.lt.s32.totalorder %s15_s7, %s15_s7 }
   0x4   :  { %p64_p0 = scmp.ne.s32.totalorder %s15_s7, %s63_s8  ;;  %p69_p2 = scmp.lt.s32.totalorder %s63_s8, %s63_s8 }
   0x6   :  { %p70_p3 = por %p69_p2, %p68_p1 }
   0x8   :  { %p71_p4 = pnand %p70_p3, %p64_p0 }
   0xa   :  { %74 = shalt.err (!%p71_p4)
}
   0xb   :  { %17 = dma.hbm_to_vmem [thread:$0]  %s119_s0, 32, %s15_s7, [#allocation3]  }
   0xc   :  { %95 = dma.done.wait [#allocation3], 32  }
   0xd   :  { %96 = vsyncadd [#allocation3], 4294967264  ;;  %v21_v0 = vld [vmem:[#allocation2] sm:$0x3]  ;;  %vm23_vm0 = vcmask 91136   ;;  %s100_s11 = smov 12  }
   0xe   :  { %v22_v1 = vmax.f32 %v21_v0, 0.0  ;;  %s101_s12 = smov 24   ;;  %vm29_vm1 = vcmask 189536   ;;  %s102_s13 = smov [#allocation5]   ;;  %vm34_vm2 = vcmask 287936  }
   0xf   :  { %s42_s14 = sshll.u32 %s102_s13, 4  ;;  %s43_s14 = int_to_ptr.vmem [resolvable:$true] %s42_s14 }
  0x10   :  { %26 = vrot.lane.b32.xlu0 %v22_v1, %s100_s11  ;;  %24 = vst.msk [vmem:[#allocation5] sm:$0x3] %vm23_vm0, %v22_v1  ;;  %s75_s0 = scalar_lea.vmem %s43_s14, 32  ;;  %p80_p6 = scmp.lt.s32.totalorder %s43_s14, %s43_s14 }
  0x11   :  { %p76_p5 = scmp.ne.s32.totalorder %s43_s14, %s75_s0  ;;  %p81_p7 = scmp.lt.s32.totalorder %s75_s0, %s75_s0 }
  0x13   :  { %p82_p8 = por %p81_p7, %p80_p6 }
  0x14   :  { %31 = vrot.lane.b32.xlu0 %v22_v1, %s101_s12 }
  0x15   :  { %p83_p9 = pnand %p82_p8, %p76_p5 }
  0x82   :  { %v27_v2 = vpop.permute.xlu0 %26 }
  0x83   :  { %30 = vst.msk [vmem:[#allocation5] sm:$0x3] %vm29_vm1, %v27_v2 }
  0x86   :  { %v32_v3 = vpop.permute.xlu0 %31 }
  0x87   :  { %35 = vst.msk [vmem:[#allocation5] sm:$0x3] %vm34_vm2, %v32_v3 }
  0x88   :  { %86 = shalt.err (!%p83_p9)
}
  0x89   :  { %45 = dma.vmem_to_hbm [thread:$0]  %s43_s14, 32, %s120_s1, [#allocation4]  }
  0x8a   :  { %97 = dma.done.wait [#allocation4], 32  }
  0x8b   :  { %98 = vsyncadd [#allocation4], 4294967264 }
  0x8c   :  { %49 = vsyncpa [#allocation3], 1 }
  0x8d   :  { %50 = vsyncpa [#allocation4], 1 }

</bundles_post_ra>
